<compile_context>
chip_gen: v7x
topology: tpu7x:2x2x1
jax: 0.10.0
libtpu: 0.0.40
codegen_flags: <defaults>
</compile_context>

<pallas_src>
import functools
import math

import jax
import jax.numpy as jnp
from jax import lax
from jax.experimental import pallas as pl
from jax.experimental.pallas import tpu as pltpu

NEG_SLOPE = 0.01   # torch.nn.LeakyReLU default negative_slope
LANE = 128


def _round_up(x, m):
    return ((x + m - 1) // m) * m


# ---------------------------------------------------------------------------
# Kernel A: global kernel
#   gk = dot_scale * mean(x_local, axis=1) @ conv_kernel          -> (1, gk^2)
#   Tiled over row blocks; the (1, gk^2) output stays resident across the grid
#   and is accumulated (elementwise mul + sublane reduce, no degenerate MXU
#   matvec), then scaled on the last step.
# ---------------------------------------------------------------------------
def _global_kernel_body(xl_ref, ck_ref, gk_ref, *, inv_n_u, dot_scale):
    @pl.when(pl.program_id(0) == 0)
    def _():
        gk_ref[...] = jnp.zeros_like(gk_ref)

    avg = jnp.sum(xl_ref[...], axis=1, keepdims=True) * inv_n_u      # (tm, 1)
    gk_ref[...] += jnp.sum(ck_ref[...] * avg, axis=0, keepdims=True)  # (1, gk2)

    @pl.when(pl.program_id(0) == pl.num_programs(0) - 1)
    def _():
        gk_ref[...] = gk_ref[...] * dot_scale


def _make_global_kernel(n_m_pad, n_u, gk2, tm, dot_scale):
    body = functools.partial(_global_kernel_body,
                             inv_n_u=1.0 / float(n_u),
                             dot_scale=float(dot_scale))
    return pl.pallas_call(
        body,
        out_shape=jax.ShapeDtypeStruct((1, gk2), jnp.float32),
        grid=(n_m_pad // tm,),
        in_specs=[pl.BlockSpec((tm, n_u), lambda i: (i, 0)),
                  pl.BlockSpec((tm, gk2), lambda i: (i, 0))],
        out_specs=pl.BlockSpec((1, gk2), lambda i: (0, 0)),
        compiler_params=pltpu.CompilerParams(
            dimension_semantics=("arbitrary",)),
    )


# ---------------------------------------------------------------------------
# Kernel B: fused global_conv (3x3 'same' conv + LeakyReLU) + KernelNet,
# tiled over row blocks.  Conv taps are SMEM scalars; xg / y1 never leave
# VMEM; weights (bf16, precomputed w_eff = W * w_hat) stay resident.
# ---------------------------------------------------------------------------
def _fused_body(gk_ref, x_ref, halo_ref, w1_ref, b1_ref, w2_ref, b2_ref,
                y_ref, xext_ref, *, n_u):
    tm = x_ref.shape[0]
    n_u_pad = x_ref.shape[1]

    # Halo-extended tile: [row above block ; block ; row below block].
    xext_ref[0:1, :] = halo_ref[0:1, :]
    xext_ref[1:tm + 1, :] = x_ref[...]
    xext_ref[tm + 1:tm + 2, :] = halo_ref[1:2, :]

    # 3x3 cross-correlation with 'same' padding.  Vertical taps = three static
    # sublane-offset slices of xext; horizontal taps = lane rolls + edge masks
    # built from a (1, n_u_pad) iota (left edge always masked, right edge
    # masked at the last real user column; padded columns are zero anyway).
    col = lax.broadcasted_iota(jnp.int32, (1, n_u_pad), 1)
    has_left = col >= 1
    has_right = col < (n_u - 1)

    acc = jnp.zeros((tm, n_u_pad), jnp.float32)
    for di in range(3):
        row = xext_ref[di:di + tm, :]                         # x[i + di - 1, :]
        acc = acc + gk_ref[0, 3 * di + 1] * row               # centre tap
        left = jnp.where(has_left, pltpu.roll(row, shift=1, axis=1), 0.0)
        acc = acc + gk_ref[0, 3 * di + 0] * left               # x[:, j-1]
        right = jnp.where(has_right,
                          pltpu.roll(row, shift=n_u_pad - 1, axis=1), 0.0)
        acc = acc + gk_ref[0, 3 * di + 2] * right              # x[:, j+1]
    xg = jnp.where(acc >= 0.0, acc, NEG_SLOPE * acc)           # LeakyReLU

    # Local kernel net: the x-independent w_eff = W * w_hat is precomputed in
    # the wrapper (bf16, zero-padded); matmuls accumulate in f32 on the MXU.
    y1 = jnp.dot(xg.astype(jnp.bfloat16), w1_ref[...],
                 preferred_element_type=jnp.float32)
    y1 = jax.nn.sigmoid(y1 + b1_ref[...])
    # TODO(synk): dropout between the two local layers omitted (eval mode).
    y2 = jnp.dot(y1.astype(jnp.bfloat16), w2_ref[...],
                 preferred_element_type=jnp.float32)
    y_ref[...] = y2 + b2_ref[...]


def _make_fused(n_m_pad, n_u, n_u_pad, n_hid_pad, gk2, tm):
    body = functools.partial(_fused_body, n_u=n_u)
    return pl.pallas_call(
        body,
        out_shape=jax.ShapeDtypeStruct((n_m_pad, n_u_pad), jnp.float32),
        grid=(n_m_pad // tm,),
        in_specs=[
            pl.BlockSpec(memory_space=pltpu.MemorySpace.SMEM),      # gk (1,gk2)
            pl.BlockSpec((tm, n_u_pad), lambda i: (i, 0)),          # x row block
            pl.BlockSpec((None, 2, n_u_pad), lambda i: (i, 0, 0)),  # halo rows
            pl.BlockSpec((n_u_pad, n_hid_pad), lambda i: (0, 0)),   # w_eff1 bf16
            pl.BlockSpec((1, n_hid_pad), lambda i: (0, 0)),         # b1
            pl.BlockSpec((n_hid_pad, n_u_pad), lambda i: (0, 0)),   # w_eff2 bf16
            pl.BlockSpec((1, n_u_pad), lambda i: (0, 0)),           # b2
        ],
        out_specs=pl.BlockSpec((tm, n_u_pad), lambda i: (i, 0)),
        scratch_shapes=[pltpu.VMEM((tm + 2, n_u_pad), jnp.float32)],
        compiler_params=pltpu.CompilerParams(
            dimension_semantics=("parallel",),
            vmem_limit_bytes=48 * 1024 * 1024),
    )


# ---------------------------------------------------------------------------
# Model wrapper (parameter setup / x-independent precompute in plain JAX,
# hot-path compute in Pallas)
# ---------------------------------------------------------------------------
class GlobalLocalKernelModelPallas:
    def __init__(self, key, n_m, n_u, n_hid, n_dim, gk_size, dot_scale,
                 lambda_s=0.006, lambda_2=20.0, block_rows=256):
        assert gk_size == 3, "padding=1 'same' conv implemented for gk_size=3"
        gk2 = gk_size * gk_size
        ks = jax.random.split(key, 9)

        # conv_kernel: xavier_uniform with gain = calculate_gain('leaky_relu')
        gain = math.sqrt(2.0 / (1.0 + 0.01 ** 2))
        bound = gain * math.sqrt(6.0 / (n_m + gk2))
        self.conv_kernel = jax.random.uniform(ks[0], (n_m, gk2),
                                              jnp.float32, -bound, bound)

        # Local kernel net (GLocal-K KernelNet): n_u -> n_hid -> n_u
        self.W1 = 1e-1 * jax.random.normal(ks[1], (n_u, n_hid), jnp.float32)
        self.u1 = 1e-1 * jax.random.normal(ks[2], (n_u, n_dim), jnp.float32)
        self.v1 = 1e-1 * jax.random.normal(ks[3], (n_hid, n_dim), jnp.float32)
        self.b1 = 1e-2 * jax.random.normal(ks[4], (1, n_hid), jnp.float32)
        self.W2 = 1e-1 * jax.random.normal(ks[5], (n_hid, n_u), jnp.float32)
        self.u2 = 1e-1 * jax.random.normal(ks[6], (n_hid, n_dim), jnp.float32)
        self.v2 = 1e-1 * jax.random.normal(ks[7], (n_u, n_dim), jnp.float32)
        self.b2 = 1e-2 * jax.random.normal(ks[8], (1, n_u), jnp.float32)

        # ---- padded / tiled shapes -----------------------------------------
        tm = max(8, min(_round_up(block_rows, 8), _round_up(n_m, 8)))
        n_m_pad = _round_up(n_m, tm)
        n_u_pad = _round_up(n_u, LANE)
        n_hid_pad = _round_up(n_hid, LANE)
        n_blocks = n_m_pad // tm

        # ---- x-independent precompute (hoisted out of the kernels) ---------
        def w_hat_fn(u, v):                      # explicit-difference form
            diff = u[:, None, :] - v[None, :, :]
            d2 = jnp.sum(diff * diff, axis=-1)
            return jnp.maximum(1.0 - d2, 0.0)

        w_hat1 = w_hat_fn(self.u1, self.v1)                   # (n_u, n_hid)
        w_hat2 = w_hat_fn(self.u2, self.v2)                   # (n_hid, n_u)
        reg_loss = (lambda_s * (jnp.mean(w_hat1 ** 2) + jnp.mean(w_hat2 ** 2))
                    + lambda_2 * (jnp.mean(self.W1 ** 2) + jnp.mean(self.W2 ** 2)))
        self.reg_loss = reg_loss.astype(jnp.float32)

        def pad_to(a, rows, cols, dtype):
            a = a.astype(dtype)
            if a.shape == (rows, cols):
                return a
            out = jnp.zeros((rows, cols), dtype)
            return out.at[:a.shape[0], :a.shape[1]].set(a)

        w_eff1 = pad_to(self.W1 * w_hat1, n_u_pad, n_hid_pad, jnp.bfloat16)
        b1p = pad_to(self.b1, 1, n_hid_pad, jnp.float32)
        w_eff2 = pad_to(self.W2 * w_hat2, n_hid_pad, n_u_pad, jnp.bfloat16)
        b2p = pad_to(self.b2, 1, n_u_pad, jnp.float32)
        ck_pad = pad_to(self.conv_kernel, n_m_pad, gk2, jnp.float32)

        global_call = _make_global_kernel(n_m_pad, n_u, gk2, tm, dot_scale)
        fused_call = _make_fused(n_m_pad, n_u, n_u_pad, n_hid_pad, gk2, tm)
        reg_const = self.reg_loss

        def _forward(x, x_local):
            x = x.astype(jnp.float32)
            x_local = x_local.astype(jnp.float32)

            if (n_m, n_u) == (n_m_pad, n_u_pad):
                x_p = x
            else:
                x_p = jnp.zeros((n_m_pad, n_u_pad), jnp.float32)
                x_p = x_p.at[:n_m, :n_u].set(x)
            if n_m == n_m_pad:
                xl_p = x_local
            else:
                xl_p = jnp.zeros((n_m_pad, n_u), jnp.float32)
                xl_p = xl_p.at[:n_m, :].set(x_local)

            gk = global_call(xl_p, ck_pad)                       # (1, gk2)

            # 1-row conv halo per block (zero rows at the matrix boundary).
            zero_row = jnp.zeros((1, n_u_pad), jnp.float32)
            if n_blocks > 1:
                above = jnp.concatenate(
                    [zero_row, x_p[tm - 1:n_m_pad - 1:tm, :]], axis=0)
                below = jnp.concatenate(
                    [x_p[tm:n_m_pad:tm, :], zero_row], axis=0)
            else:
                above, below = zero_row, zero_row
            halo = jnp.stack([above, below], axis=1)   # (n_blocks, 2, n_u_pad)

            y_p = fused_call(gk, x_p, halo, w_eff1, b1p, w_eff2, b2p)
            return y_p[:n_m, :n_u], reg_const

        self._forward = jax.jit(_forward)

    def __call__(self, x, x_local):
        return self._forward(x, x_local)


if __name__ == "__main__":
    # Small demo shapes (ragged on purpose: exercises row padding, 128-lane
    # column padding and a 3-step row-block grid with conv halos).
    n_m, n_u, n_hid, n_dim, gk_size = 40, 96, 40, 8, 3
    dot_scale = 1.0

    key = jax.random.PRNGKey(0)
    k_model, k_x, k_xl = jax.random.split(key, 3)

    model = GlobalLocalKernelModelPallas(k_model, n_m, n_u, n_hid, n_dim,
                                         gk_size, dot_scale, block_rows=16)

    x = jax.random.uniform(k_x, (n_m, n_u), jnp.float32)
    x_local = jax.random.uniform(k_xl, (n_m, n_u), jnp.float32)

    y, reg_loss = model(x, x_local)
    jax.block_until_ready((y, reg_loss))
    assert y.shape == (n_m, n_u)
    assert reg_loss.shape == ()
    print("KERNEL_OK")
</pallas_src>

<mosaic_0001>
module attributes {stable_mosaic.version = 11 : i64} {
  func.func @_global_kernel_body(%arg0: i32, %arg1: memref<16x96xf32, #tpu.memory_space<vmem>>, %arg2: memref<16x9xf32, #tpu.memory_space<vmem>>, %arg3: memref<1x9xf32, #tpu.memory_space<vmem>>) attributes {dimension_semantics = [#tpu.dimension_semantics<arbitrary>], iteration_bounds = array<i64: 3>, scalar_prefetch = 0 : i64, scratch_operands = 0 : i64, tpu.core_type = #tpu.core_type<tc>, window_params = [{transform_indices = @transform_0, window_bounds = array<i64: 16, 96>}, {transform_indices = @transform_1, window_bounds = array<i64: 16, 9>}, {pipeline_mode = #tpu.pipeline_mode<synchronous>, transform_indices = @transform_2, window_bounds = array<i64: 1, 9>}]} {
    %c0_i32 = arith.constant 0 : i32
    %0 = arith.cmpi eq, %arg0, %c0_i32 : i32
    %1 = arith.extui %0 : i1 to i32
    %c0_i32_0 = arith.constant 0 : i32
    %2 = arith.cmpi ne, %1, %c0_i32_0 : i32
    scf.if %2 {
      %cst_11 = arith.constant 0.000000e+00 : f32
      %19 = vector.broadcast %cst_11 : f32 to vector<1x9xf32>
      %c0_12 = arith.constant 0 : index
      %c0_13 = arith.constant 0 : index
      %20 = vector.load %arg3[%c0_12, %c0_13] : memref<1x9xf32, #tpu.memory_space<vmem>>, vector<1x9xf32>
      tpu.vector_store %arg3[%c0_12, %c0_13], %19 {strides = array<i32>} : memref<1x9xf32, #tpu.memory_space<vmem>>, vector<1x9xf32>,
    } else {
    }
    %c0 = arith.constant 0 : index
    %c0_1 = arith.constant 0 : index
    %3 = vector.load %arg1[%c0, %c0_1] : memref<16x96xf32, #tpu.memory_space<vmem>>, vector<16x96xf32>
    %cst = arith.constant dense<0.000000e+00> : vector<16xf32>
    %4 = vector.multi_reduction <add>, %3, %cst [1] : vector<16x96xf32> to vector<16xf32>
    %5 = vector.shape_cast %4 : vector<16xf32> to vector<16x1xf32>
    %cst_2 = arith.constant 0.010416667 : f32
    %6 = vector.broadcast %cst_2 : f32 to vector<16x1xf32>
    %7 = arith.mulf %5, %6 : vector<16x1xf32>
    %c0_3 = arith.constant 0 : index
    %c0_4 = arith.constant 0 : index
    %8 = vector.load %arg3[%c0_3, %c0_4] : memref<1x9xf32, #tpu.memory_space<vmem>>, vector<1x9xf32>
    %c0_5 = arith.constant 0 : index
    %c0_6 = arith.constant 0 : index
    %9 = vector.load %arg2[%c0_5, %c0_6] : memref<16x9xf32, #tpu.memory_space<vmem>>, vector<16x9xf32>
    %10 = vector.broadcast %7 : vector<16x1xf32> to vector<16x9xf32>
    %11 = arith.mulf %9, %10 : vector<16x9xf32>
    %cst_7 = arith.constant dense<0.000000e+00> : vector<9xf32>
    %12 = vector.multi_reduction <add>, %11, %cst_7 [0] : vector<16x9xf32> to vector<9xf32>
    %13 = vector.shape_cast %12 : vector<9xf32> to vector<1x9xf32>
    %14 = arith.addf %8, %13 : vector<1x9xf32>
    %c0_8 = arith.constant 0 : index
    %c0_9 = arith.constant 0 : index
    %15 = vector.load %arg3[%c0_8, %c0_9] : memref<1x9xf32, #tpu.memory_space<vmem>>, vector<1x9xf32>
    tpu.vector_store %arg3[%c0_8, %c0_9], %14 {strides = array<i32>} : memref<1x9xf32, #tpu.memory_space<vmem>>, vector<1x9xf32>,
    %c2_i32 = arith.constant 2 : i32
    %16 = arith.cmpi eq, %arg0, %c2_i32 : i32
    %17 = arith.extui %16 : i1 to i32
    %c0_i32_10 = arith.constant 0 : i32
    %18 = arith.cmpi ne, %17, %c0_i32_10 : i32
    scf.if %18 {
      %c0_11 = arith.constant 0 : index
      %c0_12 = arith.constant 0 : index
      %19 = vector.load %arg3[%c0_11, %c0_12] : memref<1x9xf32, #tpu.memory_space<vmem>>, vector<1x9xf32>
      %cst_13 = arith.constant 1.000000e+00 : f32
      %20 = vector.broadcast %cst_13 : f32 to vector<1x9xf32>
      %21 = arith.mulf %19, %20 : vector<1x9xf32>
      %c0_14 = arith.constant 0 : index
      %c0_15 = arith.constant 0 : index
      %22 = vector.load %arg3[%c0_14, %c0_15] : memref<1x9xf32, #tpu.memory_space<vmem>>, vector<1x9xf32>
      tpu.vector_store %arg3[%c0_14, %c0_15], %21 {strides = array<i32>} : memref<1x9xf32, #tpu.memory_space<vmem>>, vector<1x9xf32>,
    } else {
    }
    return
  }
  func.func @transform_0(%arg0: i32) -> (i32, i32) {
    %c0_i32 = arith.constant 0 : i32
    %c0_i32_0 = arith.constant 0 : i32
    return %arg0, %c0_i32 : i32, i32
  }
  func.func @transform_1(%arg0: i32) -> (i32, i32) {
    %c0_i32 = arith.constant 0 : i32
    %c0_i32_0 = arith.constant 0 : i32
    return %arg0, %c0_i32 : i32, i32
  }
  func.func @transform_2(%arg0: i32) -> (i32, i32) {
    %c0_i32 = arith.constant 0 : i32
    %c0_i32_0 = arith.constant 0 : i32
    %c0_i32_1 = arith.constant 0 : i32
    return %c0_i32, %c0_i32_0 : i32, i32
  }
}

module attributes {stable_mosaic.version = 11 : i64} {
  func.func @_fused_body(%arg0: i32, %arg1: memref<1x9xf32, #tpu.memory_space<smem>>, %arg2: memref<16x128xf32, #tpu.memory_space<vmem>>, %arg3: memref<1x2x128xf32, #tpu.memory_space<vmem>>, %arg4: memref<128x128xbf16, #tpu.memory_space<vmem>>, %arg5: memref<1x128xf32, #tpu.memory_space<vmem>>, %arg6: memref<128x128xbf16, #tpu.memory_space<vmem>>, %arg7: memref<1x128xf32, #tpu.memory_space<vmem>>, %arg8: memref<16x128xf32, #tpu.memory_space<vmem>>, %arg9: memref<18x128xf32, #tpu.memory_space<vmem>>) attributes {dimension_semantics = [#tpu.dimension_semantics<parallel>], iteration_bounds = array<i64: 3>, scalar_prefetch = 0 : i64, scratch_operands = 1 : i64, tpu.core_type = #tpu.core_type<tc>, window_params = [{transform_indices = @transform_0, window_bounds = array<i64: 1, 9>}, {transform_indices = @transform_1, window_bounds = array<i64: 16, 128>}, {transform_indices = @transform_2, window_bounds = array<i64: 1, 2, 128>}, {pipeline_mode = #tpu.pipeline_mode<synchronous>, transform_indices = @transform_3, window_bounds = array<i64: 128, 128>}, {pipeline_mode = #tpu.pipeline_mode<synchronous>, transform_indices = @transform_4, window_bounds = array<i64: 1, 128>}, {pipeline_mode = #tpu.pipeline_mode<synchronous>, transform_indices = @transform_5, window_bounds = array<i64: 128, 128>}, {pipeline_mode = #tpu.pipeline_mode<synchronous>, transform_indices = @transform_6, window_bounds = array<i64: 1, 128>}, {transform_indices = @transform_7, window_bounds = array<i64: 16, 128>}]} {
    %c0 = arith.constant 0 : index
    %c0_0 = arith.constant 0 : index
    %c0_1 = arith.constant 0 : index
    %0 = vector.load %arg3[%c0, %c0_0, %c0_1] : memref<1x2x128xf32, #tpu.memory_space<vmem>>, vector<1x1x128xf32>
    %1 = vector.shape_cast %0 : vector<1x1x128xf32> to vector<1x128xf32>
    %c0_2 = arith.constant 0 : index
    %c0_3 = arith.constant 0 : index
    %2 = vector.load %arg9[%c0_2, %c0_3] : memref<18x128xf32, #tpu.memory_space<vmem>>, vector<1x128xf32>
    tpu.vector_store %arg9[%c0_2, %c0_3], %1 {strides = array<i32>} : memref<18x128xf32, #tpu.memory_space<vmem>>, vector<1x128xf32>,
    %c0_4 = arith.constant 0 : index
    %c0_5 = arith.constant 0 : index
    %3 = vector.load %arg2[%c0_4, %c0_5] : memref<16x128xf32, #tpu.memory_space<vmem>>, vector<16x128xf32>
    %c1 = arith.constant 1 : index
    %c0_6 = arith.constant 0 : index
    %4 = vector.load %arg9[%c1, %c0_6] : memref<18x128xf32, #tpu.memory_space<vmem>>, vector<16x128xf32>
    tpu.vector_store %arg9[%c1, %c0_6], %3 {strides = array<i32>} : memref<18x128xf32, #tpu.memory_space<vmem>>, vector<16x128xf32>,
    %c0_7 = arith.constant 0 : index
    %c1_8 = arith.constant 1 : index
    %c0_9 = arith.constant 0 : index
    %5 = vector.load %arg3[%c0_7, %c1_8, %c0_9] : memref<1x2x128xf32, #tpu.memory_space<vmem>>, vector<1x1x128xf32>
    %6 = vector.shape_cast %5 : vector<1x1x128xf32> to vector<1x128xf32>
    %c17 = arith.constant 17 : index
    %c0_10 = arith.constant 0 : index
    %7 = vector.load %arg9[%c17, %c0_10] : memref<18x128xf32, #tpu.memory_space<vmem>>, vector<1x128xf32>
    tpu.vector_store %arg9[%c17, %c0_10], %6 {strides = array<i32>} : memref<18x128xf32, #tpu.memory_space<vmem>>, vector<1x128xf32>,
    %8 = tpu.iota {dimensions = array<i32: 1>} : vector<1x128xi32>
    %c1_i32 = arith.constant 1 : i32
    %9 = vector.broadcast %c1_i32 : i32 to vector<1x128xi32>
    %10 = arith.cmpi sge, %8, %9 : vector<1x128xi32>
    %c95_i32 = arith.constant 95 : i32
    %11 = vector.broadcast %c95_i32 : i32 to vector<1x128xi32>
    %12 = arith.cmpi slt, %8, %11 : vector<1x128xi32>
    %cst = arith.constant 0.000000e+00 : f32
    %13 = vector.broadcast %cst : f32 to vector<16x128xf32>
    %c0_11 = arith.constant 0 : index
    %c0_12 = arith.constant 0 : index
    %14 = vector.load %arg9[%c0_11, %c0_12] : memref<18x128xf32, #tpu.memory_space<vmem>>, vector<16x128xf32>
    %c0_13 = arith.constant 0 : index
    %c1_14 = arith.constant 1 : index
    %15 = memref.load %arg1[%c0_13, %c1_14] : memref<1x9xf32, #tpu.memory_space<smem>>
    %16 = vector.broadcast %15 : f32 to vector<16x128xf32>
    %17 = arith.mulf %16, %14 : vector<16x128xf32>
    %18 = arith.addf %13, %17 : vector<16x128xf32>
    %c1_i32_15 = arith.constant 1 : i32
    %19 = tpu.dynamic_rotate %14 by %c1_i32_15 dim 1 : vector<16x128xf32>, i32 -> vector<16x128xf32>
    %cst_16 = arith.constant 0.000000e+00 : f32
    %20 = vector.shape_cast %10 : vector<1x128xi1> to vector<1x128xi1>
    %21 = vector.broadcast %20 : vector<1x128xi1> to vector<16x128xi1>
    %22 = vector.broadcast %cst_16 : f32 to vector<16x128xf32>
    %23 = arith.select %21, %19, %22 : vector<16x128xi1>, vector<16x128xf32>
    %c0_17 = arith.constant 0 : index
    %c0_18 = arith.constant 0 : index
    %24 = memref.load %arg1[%c0_17, %c0_18] : memref<1x9xf32, #tpu.memory_space<smem>>
    %25 = vector.broadcast %24 : f32 to vector<16x128xf32>
    %26 = arith.mulf %25, %23 : vector<16x128xf32>
    %27 = arith.addf %18, %26 : vector<16x128xf32>
    %c127_i32 = arith.constant 127 : i32
    %28 = tpu.dynamic_rotate %14 by %c127_i32 dim 1 : vector<16x128xf32>, i32 -> vector<16x128xf32>
    %cst_19 = arith.constant 0.000000e+00 : f32
    %29 = vector.shape_cast %12 : vector<1x128xi1> to vector<1x128xi1>
    %30 = vector.broadcast %29 : vector<1x128xi1> to vector<16x128xi1>
    %31 = vector.broadcast %cst_19 : f32 to vector<16x128xf32>
    %32 = arith.select %30, %28, %31 : vector<16x128xi1>, vector<16x128xf32>
    %c0_20 = arith.constant 0 : index
    %c2 = arith.constant 2 : index
    %33 = memref.load %arg1[%c0_20, %c2] : memref<1x9xf32, #tpu.memory_space<smem>>
    %34 = vector.broadcast %33 : f32 to vector<16x128xf32>
    %35 = arith.mulf %34, %32 : vector<16x128xf32>
    %36 = arith.addf %27, %35 : vector<16x128xf32>
    %c1_21 = arith.constant 1 : index
    %c0_22 = arith.constant 0 : index
    %37 = vector.load %arg9[%c1_21, %c0_22] : memref<18x128xf32, #tpu.memory_space<vmem>>, vector<16x128xf32>
    %c0_23 = arith.constant 0 : index
    %c4 = arith.constant 4 : index
    %38 = memref.load %arg1[%c0_23, %c4] : memref<1x9xf32, #tpu.memory_space<smem>>
    %39 = vector.broadcast %38 : f32 to vector<16x128xf32>
    %40 = arith.mulf %39, %37 : vector<16x128xf32>
    %41 = arith.addf %36, %40 : vector<16x128xf32>
    %c1_i32_24 = arith.constant 1 : i32
    %42 = tpu.dynamic_rotate %37 by %c1_i32_24 dim 1 : vector<16x128xf32>, i32 -> vector<16x128xf32>
    %cst_25 = arith.constant 0.000000e+00 : f32
    %43 = vector.shape_cast %10 : vector<1x128xi1> to vector<1x128xi1>
    %44 = vector.broadcast %43 : vector<1x128xi1> to vector<16x128xi1>
    %45 = vector.broadcast %cst_25 : f32 to vector<16x128xf32>
    %46 = arith.select %44, %42, %45 : vector<16x128xi1>, vector<16x128xf32>
    %c0_26 = arith.constant 0 : index
    %c3 = arith.constant 3 : index
    %47 = memref.load %arg1[%c0_26, %c3] : memref<1x9xf32, #tpu.memory_space<smem>>
    %48 = vector.broadcast %47 : f32 to vector<16x128xf32>
    %49 = arith.mulf %48, %46 : vector<16x128xf32>
    %50 = arith.addf %41, %49 : vector<16x128xf32>
    %c127_i32_27 = arith.constant 127 : i32
    %51 = tpu.dynamic_rotate %37 by %c127_i32_27 dim 1 : vector<16x128xf32>, i32 -> vector<16x128xf32>
    %cst_28 = arith.constant 0.000000e+00 : f32
    %52 = vector.shape_cast %12 : vector<1x128xi1> to vector<1x128xi1>
    %53 = vector.broadcast %52 : vector<1x128xi1> to vector<16x128xi1>
    %54 = vector.broadcast %cst_28 : f32 to vector<16x128xf32>
    %55 = arith.select %53, %51, %54 : vector<16x128xi1>, vector<16x128xf32>
    %c0_29 = arith.constant 0 : index
    %c5 = arith.constant 5 : index
    %56 = memref.load %arg1[%c0_29, %c5] : memref<1x9xf32, #tpu.memory_space<smem>>
    %57 = vector.broadcast %56 : f32 to vector<16x128xf32>
    %58 = arith.mulf %57, %55 : vector<16x128xf32>
    %59 = arith.addf %50, %58 : vector<16x128xf32>
    %c2_30 = arith.constant 2 : index
    %c0_31 = arith.constant 0 : index
    %60 = vector.load %arg9[%c2_30, %c0_31] : memref<18x128xf32, #tpu.memory_space<vmem>>, vector<16x128xf32>
    %c0_32 = arith.constant 0 : index
    %c7 = arith.constant 7 : index
    %61 = memref.load %arg1[%c0_32, %c7] : memref<1x9xf32, #tpu.memory_space<smem>>
    %62 = vector.broadcast %61 : f32 to vector<16x128xf32>
    %63 = arith.mulf %62, %60 : vector<16x128xf32>
    %64 = arith.addf %59, %63 : vector<16x128xf32>
    %c1_i32_33 = arith.constant 1 : i32
    %65 = tpu.dynamic_rotate %60 by %c1_i32_33 dim 1 : vector<16x128xf32>, i32 -> vector<16x128xf32>
    %cst_34 = arith.constant 0.000000e+00 : f32
    %66 = vector.shape_cast %10 : vector<1x128xi1> to vector<1x128xi1>
    %67 = vector.broadcast %66 : vector<1x128xi1> to vector<16x128xi1>
    %68 = vector.broadcast %cst_34 : f32 to vector<16x128xf32>
    %69 = arith.select %67, %65, %68 : vector<16x128xi1>, vector<16x128xf32>
    %c0_35 = arith.constant 0 : index
    %c6 = arith.constant 6 : index
    %70 = memref.load %arg1[%c0_35, %c6] : memref<1x9xf32, #tpu.memory_space<smem>>
    %71 = vector.broadcast %70 : f32 to vector<16x128xf32>
    %72 = arith.mulf %71, %69 : vector<16x128xf32>
    %73 = arith.addf %64, %72 : vector<16x128xf32>
    %c127_i32_36 = arith.constant 127 : i32
    %74 = tpu.dynamic_rotate %60 by %c127_i32_36 dim 1 : vector<16x128xf32>, i32 -> vector<16x128xf32>
    %cst_37 = arith.constant 0.000000e+00 : f32
    %75 = vector.shape_cast %12 : vector<1x128xi1> to vector<1x128xi1>
    %76 = vector.broadcast %75 : vector<1x128xi1> to vector<16x128xi1>
    %77 = vector.broadcast %cst_37 : f32 to vector<16x128xf32>
    %78 = arith.select %76, %74, %77 : vector<16x128xi1>, vector<16x128xf32>
    %c0_38 = arith.constant 0 : index
    %c8 = arith.constant 8 : index
    %79 = memref.load %arg1[%c0_38, %c8] : memref<1x9xf32, #tpu.memory_space<smem>>
    %80 = vector.broadcast %79 : f32 to vector<16x128xf32>
    %81 = arith.mulf %80, %78 : vector<16x128xf32>
    %82 = arith.addf %73, %81 : vector<16x128xf32>
    %cst_39 = arith.constant 0.000000e+00 : f32
    %83 = vector.broadcast %cst_39 : f32 to vector<16x128xf32>
    %84 = arith.cmpf oge, %82, %83 : vector<16x128xf32>
    %cst_40 = arith.constant 0.00999999977 : f32
    %85 = vector.broadcast %cst_40 : f32 to vector<16x128xf32>
    %86 = arith.mulf %85, %82 : vector<16x128xf32>
    %87 = arith.select %84, %82, %86 : vector<16x128xi1>, vector<16x128xf32>
    %88 = arith.truncf %87 : vector<16x128xf32> to vector<16x128xbf16>
    %c0_41 = arith.constant 0 : index
    %c0_42 = arith.constant 0 : index
    %89 = vector.load %arg4[%c0_41, %c0_42] : memref<128x128xbf16, #tpu.memory_space<vmem>>, vector<128x128xbf16>
    %cst_43 = arith.constant dense<0.000000e+00> : vector<16x128xf32>
    %90 = tpu.matmul %88, %89, %cst_43 {dimension_numbers = #tpu.dot_dimension_numbers<[1], [0], [0], [1], [0, 0, 1, 1], [], []>} : vector<16x128xbf16>, vector<128x128xbf16>, vector<16x128xf32> -> vector<16x128xf32>
    %c0_44 = arith.constant 0 : index
    %c0_45 = arith.constant 0 : index
    %91 = vector.load %arg5[%c0_44, %c0_45] : memref<1x128xf32, #tpu.memory_space<vmem>>, vector<1x128xf32>
    %92 = vector.broadcast %91 : vector<1x128xf32> to vector<16x128xf32>
    %93 = arith.addf %90, %92 : vector<16x128xf32>
    %94 = arith.negf %93 : vector<16x128xf32>
    %95 = math.exp %94 : vector<16x128xf32>
    %cst_46 = arith.constant 1.000000e+00 : f32
    %96 = vector.broadcast %cst_46 : f32 to vector<16x128xf32>
    %97 = arith.addf %96, %95 : vector<16x128xf32>
    %98 = arith.divf %96, %97 : vector<16x128xf32>
    %99 = arith.truncf %98 : vector<16x128xf32> to vector<16x128xbf16>
    %c0_47 = arith.constant 0 : index
    %c0_48 = arith.constant 0 : index
    %100 = vector.load %arg6[%c0_47, %c0_48] : memref<128x128xbf16, #tpu.memory_space<vmem>>, vector<128x128xbf16>
    %cst_49 = arith.constant dense<0.000000e+00> : vector<16x128xf32>
    %101 = tpu.matmul %99, %100, %cst_49 {dimension_numbers = #tpu.dot_dimension_numbers<[1], [0], [0], [1], [0, 0, 1, 1], [], []>} : vector<16x128xbf16>, vector<128x128xbf16>, vector<16x128xf32> -> vector<16x128xf32>
    %c0_50 = arith.constant 0 : index
    %c0_51 = arith.constant 0 : index
    %102 = vector.load %arg7[%c0_50, %c0_51] : memref<1x128xf32, #tpu.memory_space<vmem>>, vector<1x128xf32>
    %103 = vector.broadcast %102 : vector<1x128xf32> to vector<16x128xf32>
    %104 = arith.addf %101, %103 : vector<16x128xf32>
    %c0_52 = arith.constant 0 : index
    %c0_53 = arith.constant 0 : index
    %105 = vector.load %arg8[%c0_52, %c0_53] : memref<16x128xf32, #tpu.memory_space<vmem>>, vector<16x128xf32>
    tpu.vector_store %arg8[%c0_52, %c0_53], %104 {strides = array<i32>} : memref<16x128xf32, #tpu.memory_space<vmem>>, vector<16x128xf32>,
    return
  }
  func.func @transform_0(%arg0: i32) -> (i32, i32) {
    %c0_i32 = arith.constant 0 : i32
    %c0_i32_0 = arith.constant 0 : i32
    %c0_i32_1 = arith.constant 0 : i32
    return %c0_i32, %c0_i32_0 : i32, i32
  }
  func.func @transform_1(%arg0: i32) -> (i32, i32) {
    %c0_i32 = arith.constant 0 : i32
    %c0_i32_0 = arith.constant 0 : i32
    return %arg0, %c0_i32 : i32, i32
  }
  func.func @transform_2(%arg0: i32) -> (i32, i32, i32) {
    %c0_i32 = arith.constant 0 : i32
    %c0_i32_0 = arith.constant 0 : i32
    %c0_i32_1 = arith.constant 0 : i32
    return %arg0, %c0_i32, %c0_i32_0 : i32, i32, i32
  }
  func.func @transform_3(%arg0: i32) -> (i32, i32) {
    %c0_i32 = arith.constant 0 : i32
    %c0_i32_0 = arith.constant 0 : i32
    %c0_i32_1 = arith.constant 0 : i32
    return %c0_i32, %c0_i32_0 : i32, i32
  }
  func.func @transform_4(%arg0: i32) -> (i32, i32) {
    %c0_i32 = arith.constant 0 : i32
    %c0_i32_0 = arith.constant 0 : i32
    %c0_i32_1 = arith.constant 0 : i32
    return %c0_i32, %c0_i32_0 : i32, i32
  }
  func.func @transform_5(%arg0: i32) -> (i32, i32) {
    %c0_i32 = arith.constant 0 : i32
    %c0_i32_0 = arith.constant 0 : i32
    %c0_i32_1 = arith.constant 0 : i32
    return %c0_i32, %c0_i32_0 : i32, i32
  }
  func.func @transform_6(%arg0: i32) -> (i32, i32) {
    %c0_i32 = arith.constant 0 : i32
    %c0_i32_0 = arith.constant 0 : i32
    %c0_i32_1 = arith.constant 0 : i32
    return %c0_i32, %c0_i32_0 : i32, i32
  }
  func.func @transform_7(%arg0: i32) -> (i32, i32) {
    %c0_i32 = arith.constant 0 : i32
    %c0_i32_0 = arith.constant 0 : i32
    return %arg0, %c0_i32 : i32, i32
  }
}

</mosaic_0001>

<bundles_post_ra>
// kernel: _forward.2
= control target key start
LH: loop header
LB: loop body
LE: loop exit
PB: predicated region body
PF: predicated region fallthrough
CT: control target
= control target key end

     0   :  { %s279_s9 = smov 0   ;;  %s316_s0 = inlined_call_operand.vmem [shape: f32[48,96], index: 0, kind: input, shape index: {}]   ;;  %s317_s1 = inlined_call_operand.vmem [shape: f32[48,9], index: 1, kind: input, shape index: {}]   ;;  %s318_s2 = inlined_call_operand.vmem [shape: f32[1,9], index: 2, kind: output, shape index: {}]  }
   0x1 LB: > { %s285_s10 = sadd.s32 4294967295, %s261_s9   ;;  %p237_p0 = scmp.ge.s32.totalorder %s261_s9, 1  ;;  %s261_s9 = sphi %s279_s9, %s12_s9  }
   0x2   : > { %p119_p1 = scmp.lt.s32.totalorder %s261_s9, 4 }
   0x4   : > { %p120_p2 = pnand %p237_p0, %p119_p1 }
   0x5   : > { %s238_s11 = sshll.u32 (!%p120_p2), %s285_s10, 1  ;;  %p242_p4 = scmp.ne.s32.totalorder (!%p120_p2), %s285_s10, 0 }
   0x6   : > { %123 = sbr.rel (%p120_p2) target bundleno = 198 (0xc6), region = 28  ;;  %p142_p3 = scmp.lt.s32.totalorder (!%p120_p2), %s238_s11, 5 }
   0xd   : > { %s320_s11 = smov (!%p142_p3, %s238_s11), 5  ;;  %156 = sbr.rel (%p242_p4) target bundleno = 20 (0x14), region = 32 }
   0xe   : > { %s239_s12 = sshll.u32 %s320_s11, 3  ;;  %vm157_vm0 = vcmask (!%p242_p4), 65536   ;;  %v263_v0 = vmov (!%p242_p4), 0.0  }
   0xf   : > { %s145_s15 = scalar_lea.vmem %s316_s0, %s239_s12  ;;  %s151_s18 = scalar_lea.vmem %s317_s1, %s239_s12  ;;  %158 = vst.msk [vmem:[%s318_s2] sm:$0x1] (!%p242_p4), %vm157_vm0, %v263_v0 }
  0x14 PF: > { %v159_v1 = vld [vmem:[%s145_s15] sm:$0xff]  ;;  %vm161_vm1 = vcmask 785408   ;;  %v160_v2 = vld [vmem:[%s145_s15 + $0x8] sm:$0xff]  ;;  %vm175_vm2 = vcmask 72704   ;;  %vm186_vm3 = vcmask 65536   ;;  %p243_p5 = scmp.ne.s32.totalorder %s285_s10, 2 }
  0x15   : > { %v162_v3 = vsel %vm161_vm1, %v159_v1, 0.0  ;;  %v165_v4 = vsel %vm161_vm1, %v160_v2, 0.0  ;;  %v171_v7 = vld [vmem:[%s151_s18] sm:$0xff]  ;;  %v172_v8 = vld [vmem:[%s151_s18 + $0x8] sm:$0xff] }
  0x16   : > { %163 = vadd.xlane.f32.xlu0 %v162_v3  ;;  %v170_v21 = vld [vmem:[%s318_s2] sm:$0x1] }
  0x1a   : > { %166 = vadd.xlane.f32.xlu0 %v165_v4 }
  0xa3   : > { %v164_v5 = vpop.xlane.xlu0 %163 }
  0xa4   : > { %v168_v6 = vmul.f32 0.010416667, %v164_v5 }
  0xa6   : > { %v173_v10 = vmul.f32 %v171_v7, %v168_v6 }
  0xa7   : > { %v167_v9 = vpop.xlane.xlu0 %166 }
  0xa8   : > { %v169_v11 = vmul.f32 0.010416667, %v167_v9  ;;  %v176_v13 = vsel %vm175_vm2, %v173_v10, 0.0 }
  0xaa   : > { %v174_v12 = vmul.f32 %v172_v8, %v169_v11 }
  0xac   : > { %v177_v14 = vsel %vm175_vm2, %v174_v12, 0.0 }
  0xad   : > { %v178_v15 = vadd.f32 %v177_v14, %v176_v13 }
  0xaf   : > { %v179_v16 = vrot.slane %v178_v15, 4 }
  0xb1   : > { %v180_v17 = vadd.f32 %v179_v16, %v178_v15 }
  0xb3   : > { %v181_v18 = vrot.slane %v180_v17, 2 }
  0xb5   : > { %v182_v19 = vadd.f32 %v181_v18, %v180_v17 }
  0xb7   : > { %v183_v20 = vrot.slane %v182_v19, 1  ;;  %191 = sbr.rel (%p243_p5) target bundleno = 198 (0xc6), region = 36 }
  0xb9   : > { %v184_v22 = vadd.f32 %v183_v20, %v182_v19 }
  0xbb   : > { %v185_v23 = vadd.f32 %v184_v22, %v170_v21 }
  0xbd   : > { %187 = vst.msk [vmem:[%s318_s2] sm:$0x1] %vm186_vm3, %v185_v23 }
  0xc4   : > { %v192_v24 = vld [vmem:[%s318_s2] sm:$0x1] }
  0xc5   : > { %193 = vst.msk [vmem:[%s318_s2] sm:$0x1] %vm186_vm3, %v192_v24 }
  0xc6 PF: > { %s12_s9 = sadd.s32 1, %s261_s9  }
  0xc7   : > { %p9_p6 = scmp.ge.s32.totalorder %s12_s9, 5  }
  0xc9   :  { %11 = sbr.rel (!%p9_p6) target bundleno = 1 (0x1), region = 65 }

// kernel: _forward.3
= control target key start
LH: loop header
LB: loop body
LE: loop exit
PB: predicated region body
PF: predicated region fallthrough
CT: control target
= control target key end

     0   :  { %12 = vsyncpa [#allocation4], 0  ;;  %s971_s24 = smov 0   ;;  %s1148_s0 = inlined_call_operand.vmem [shape: f32[1,9], index: 0, kind: input, shape index: {}]   ;;  %s1149_s1 = inlined_call_operand.vmem [shape: f32[48,128], index: 1, kind: input, shape index: {}]   ;;  %s1150_s2 = inlined_call_operand.vmem [shape: f32[3,2,128], index: 2, kind: input, shape index: {}]   ;;  %s1151_s3 = inlined_call_operand.vmem [shape: bf16[128,128], index: 3, kind: input, shape index: {}]   ;;  %s1152_s4 = inlined_call_operand.vmem [shape: f32[1,128], index: 4, kind: input, shape index: {}]   ;;  %s1153_s5 = inlined_call_operand.vmem [shape: bf16[128,128], index: 5, kind: input, shape index: {}]   ;;  %s1154_s6 = inlined_call_operand.vmem [shape: f32[1,128], index: 6, kind: input, shape index: {}]   ;;  %s1155_s7 = inlined_call_operand.vmem [shape: f32[48,128], index: 7, kind: output, shape index: {}]  }
   0x1 LB: > { %s977_s25 = sadd.s32 4294967295, %s924_s24   ;;  %p754_p0 = scmp.ge.s32.totalorder %s924_s24, 1  ;;  %s924_s24 = sphi %s971_s24, %s18_s24  }
   0x2   : > { %p206_p1 = scmp.lt.s32.totalorder %s924_s24, 4  ;;  %s219_s28 = sshll.u32 %s1148_s0, 4  ;;  %s220_s28 = int_to_ptr.vmem [resolvable:$true] %s219_s28 }
   0x3   : > { %p860_p3 = scmp.eq.s32.totalorder %s977_s25, 0  ;;  %s899_s30 = scalar_lea.vmem %s220_s28, 16 }
   0x4   : > { %p984_p2 = pnand %p754_p0, %p206_p1  ;;  %p900_p6 = scmp.ne.s32.totalorder %s220_s28, %s899_s30 }
   0x5   : > { %p907_p10 = scmp.lt.s32.totalorder %s220_s28, %s220_s28  ;;  %p908_p11 = scmp.lt.s32.totalorder %s899_s30, %s899_s30 }
   0x6   : > { %p856_p4 = pneg %p984_p2 }
   0x7   : > { %p909_p12 = por %p908_p11, %p907_p10 }
   0x8   : > { %p857_p5 = pnand %p860_p3, %p856_p4 }
   0xa   : > { %p901_p7 = pneg %p857_p5 }
   0xc   : > { %p902_p8 = pnand %p901_p7, %p900_p6 }
   0xe   : > { %p903_p9 = pneg %p902_p8 }
  0x10   : > { %p910_p13 = pnand %p909_p12, %p903_p9 }
  0x12   : > { %913 = shalt.err (!%p910_p13)
}
  0x13   : > { %s926_s8 = smov [#allocation3]   ;;  %260 = sbr.rel (%p984_p2) target bundleno = 651 (0x28b), region = 48 }
  0x14   : > { %859 = dma.vmem_to_smem (!%p857_p5), %s220_s28, 16, %s926_s8, [#allocation4]  }
  0x1a   : > { %919 = dma.done.wait (%p860_p3), [#allocation4], 16  }
  0x1b   : > { %921 = vsyncadd (%p860_p3), [#allocation4], 4294967280 }
  0x1c   : > { %266 = sfence }
  0x1d   : > { %s759_s9 = sshll.u32 %s977_s25, 1  ;;  %p303_p0 = scmp.lt.s32.totalorder %s977_s25, 2  ;;  %v875_v0 = vld [vmem:[%s1151_s3] sm:$0xff]   ;;  %v927_v1 = vmov 0.0   ;;  %v876_v2 = vld [vmem:[%s1151_s3 + $0x8] sm:$0xff]   ;;  %v877_v7 = vld [vmem:[%s1151_s3 + $0x10] sm:$0xff]   ;;  %v322_v17 = vlaneseq }
  0x1e   : > { %p298_p1 = scmp.lt.s32.totalorder %s759_s9, 5  ;;  %812 = vmatprep.subr.bf16.mxu0 %v927_v1  ;;  %832 = vmatprep.subr.bf16.mxu1 %v927_v1  ;;  %v878_v8 = vld [vmem:[%s1151_s3 + $0x18] sm:$0xff]   ;;  %s928_s27 = smov 127   ;;  %v879_v10 = vld [vmem:[%s1151_s3 + $0x20] sm:$0xff]   ;;  %v880_v12 = vld [vmem:[%s1151_s3 + $0x28] sm:$0xff]   ;;  %vm930_vm0 = vmmov 0  }
  0x1f   : > { %s1158_s25 = smov (!%p303_p0, %s977_s25), 2  ;;  %813 = vmatpush3.bf16.msra.mxu0 %v875_v0  ;;  %s929_s28 = smov 1   ;;  %v881_v13 = vld [vmem:[%s1151_s3 + $0x30] sm:$0xff]   ;;  %v882_v14 = vld [vmem:[%s1151_s3 + $0x38] sm:$0xff]   ;;  %828 = vmatprep.mubr.msk.bf16.mxu0 %vm930_vm0, %v927_v1  ;;  %v1058_v18 = vand.u32 127, %v322_v17 }
  0x20   : > { %s1160_s9 = smov (!%p298_p1, %s759_s9), 5  ;;  %814 = vmatprep.subr.bf16.mxu0 %v927_v1  ;;  %s761_s12 = sshll.u32 %s1158_s25, 1  ;;  %848 = vmatprep.mubr.msk.bf16.mxu1 %vm930_vm0, %v927_v1 }
  0x21   : > { %s760_s15 = sshll.u32 %s1160_s9, 3  ;;  %s306_s18 = scalar_lea.vmem %s1150_s2, %s761_s12  ;;  %vm325_vm1 = vcmp.lt.s32.totalorder %v1058_v18, 95  ;;  %vm324_vm2 = vcmp.ge.s32.totalorder %v1058_v18, 1  ;;  %v884_v18 = vld [vmem:[%s1153_s5 + $0x8] sm:$0xff]  }
  0x22   : > { %s301_s21 = scalar_lea.vmem %s1149_s1, %s760_s15  ;;  %v314_v3 = vld [vmem:[%s306_s18] sm:$0x1]  ;;  %v320_v4 = vld [vmem:[%s306_s18 + $0x1] sm:$0x1]  ;;  %s764_s16 = sld [smem:[#allocation3 + $0x1]] }
  0x23   : > { %815 = vmatpush3.bf16.msra.mxu0 %v876_v2  ;;  %315 = vst [vmem:[#allocation2] sm:$0x1] %v314_v3  ;;  %v1022_v5 = vld [vmem:[%s301_s21] sm:$0xff]  ;;  %v1024_v6 = vld [vmem:[%s301_s21 + $0x8] sm:$0xff]  ;;  %321 = vst [vmem:[#allocation2 + $0x11] sm:$0x1] %v320_v4 }
  0x24   : > { %816 = vmatprep.subr.bf16.mxu0 %v927_v1  ;;  %318 = vst [vmem:[#allocation2 + $0x1] sm:$0xff] %v1022_v5  ;;  %319 = vst [vmem:[#allocation2 + $0x9] sm:$0xff] %v1024_v6  ;;  %s342_s17 = sld [smem:[#allocation3]]  ;;  %s766_s18 = sld [smem:[#allocation3 + $0x4]] }
  0x25   : > { %s765_s19 = sld [smem:[#allocation3 + $0x2]]  ;;  %s1062_s20 = sld [smem:[#allocation3 + $0x3]] }
  0x26   : > { %s1068_s21 = sld [smem:[#allocation3 + $0x7]]  ;;  %s1070_s22 = sld [smem:[#allocation3 + $0x5]] }
  0x27   : > { %817 = vmatpush3.bf16.msra.mxu0 %v877_v7  ;;  %s1078_s23 = sld [smem:[#allocation3 + $0x6]]  ;;  %s1087_s25 = sld [smem:[#allocation3 + $0x8]] }
  0x28   : > { %818 = vmatprep.subr.bf16.mxu0 %v927_v1  ;;  %v329_v19 = vstv %s764_s16 }
  0x2a   : > { %v343_v20 = vstv %s342_s17  ;;  %v365_v24 = vstv %s766_s18 }
  0x2b   : > { %819 = vmatpush3.bf16.msra.mxu0 %v878_v8  ;;  %v326_v9 = vld [vmem:[#allocation2] sm:$0xff]  ;;  %v327_v11 = vld [vmem:[#allocation2 + $0x8] sm:$0xff]  ;;  %v357_v25 = vstv %s765_s19  ;;  %v366_v30 = vmul.f32 %v365_v24, %v1022_v5  ;;  %v377_v39 = vstv %s1062_s20  ;;  %v367_v40 = vmul.f32 %v365_v24, %v1024_v6 }
  0x2c   : > { %820 = vmatprep.subr.bf16.mxu0 %v927_v1  ;;  %348 = vrot.lane.b32.xlu1 %v326_v9, %s928_s27  ;;  %v395_v15 = vld [vmem:[#allocation2 + $0xa] sm:$0xff]  ;;  %v394_v16 = vld [vmem:[#allocation2 + $0x2] sm:$0xff]  ;;  %v330_v21 = vmul.f32 %v329_v19, %v326_v9  ;;  %v331_v29 = vmul.f32 %v329_v19, %v327_v11  ;;  %v397_v48 = vstv %s1068_s21  ;;  %v389_v51 = vstv %s1070_s22 }
  0x2d   : > { %334 = vrot.lane.b32.xlu0 %v326_v9, %s929_s28  ;;  %v399_v56 = vmul.f32 %v397_v48, %v395_v15  ;;  %v398_v57 = vmul.f32 %v397_v48, %v394_v16  ;;  %v409_v0 = vstv %s1078_s23 }
  0x2f   : > { %821 = vmatpush3.bf16.msra.mxu0 %v879_v10 }
  0x30   : > { %822 = vmatprep.subr.bf16.mxu0 %v927_v1  ;;  %350 = vrot.lane.b32.xlu1 %v327_v11, %s928_s27 }
  0x31   : > { %336 = vrot.lane.b32.xlu0 %v327_v11, %s929_s28 }
  0x33   : > { %823 = vmatpush3.bf16.msra.mxu0 %v880_v12  ;;  %v421_v12 = vstv %s1087_s25 }
  0x34   : > { %824 = vmatprep.subr.bf16.mxu0 %v927_v1  ;;  %372 = vrot.lane.b32.xlu1 %v1024_v6, %s929_s28 }
  0x35   : > { %370 = vrot.lane.b32.xlu0 %v1022_v5, %s929_s28 }
  0x37   : > { %825 = vmatpush3.bf16.msra.mxu0 %v881_v13 }
  0x38   : > { %826 = vmatprep.subr.bf16.mxu0 %v927_v1  ;;  %384 = vrot.lane.b32.xlu1 %v1024_v6, %s928_s27 }
  0x39   : > { %382 = vrot.lane.b32.xlu0 %v1022_v5, %s928_s27 }
  0x3b   : > { %827 = vmatpush3.bf16.msra.mxu0 %v882_v14 }
  0x3c   : > { %404 = vrot.lane.b32.xlu1 %v395_v15, %s929_s28 }
  0x3d   : > { %402 = vrot.lane.b32.xlu0 %v394_v16, %s929_s28  ;;  %s311_s28 = scalar_lea.vmem %s1155_s7, %s760_s15 }
  0x40   : > { %416 = vrot.lane.b32.xlu1 %v395_v15, %s928_s27 }
  0x41   : > { %414 = vrot.lane.b32.xlu0 %v394_v16, %s928_s27 }
  0x9e   : > { %v349_v22 = vpop.permute.xlu1 %348 }
  0x9f   : > { %v335_v23 = vpop.permute.xlu0 %334  ;;  %v354_v26 = vsel %vm325_vm1, %v349_v22, 0.0 }
  0xa0   : > { %v340_v27 = vsel %vm324_vm2, %v335_v23, 0.0  ;;  %v358_v31 = vmul.f32 %v357_v25, %v354_v26 }
  0xa1   : > { %v344_v28 = vmul.f32 %v343_v20, %v340_v27 }
  0xa2   : > { %v351_v33 = vpop.permute.xlu1 %350 }
  0xa3   : > { %v346_v32 = vadd.f32 %v344_v28, %v330_v21  ;;  %v337_v34 = vpop.permute.xlu0 %336  ;;  %v355_v35 = vsel %vm325_vm1, %v351_v33, 0.0  ;;  %v888_v33 = vld [vmem:[%s1153_s5 + $0x28] sm:$0xff]  }
  0xa4   : > { %v341_v36 = vsel %vm324_vm2, %v337_v34, 0.0  ;;  %v359_v41 = vmul.f32 %v357_v25, %v355_v35  ;;  %v889_v34 = vld [vmem:[%s1153_s5 + $0x30] sm:$0xff]   ;;  %v890_v35 = vld [vmem:[%s1153_s5 + $0x38] sm:$0xff]  }
  0xa5   : > { %v360_v37 = vadd.f32 %v358_v31, %v346_v32  ;;  %v345_v38 = vmul.f32 %v343_v20, %v341_v36  ;;  %v886_v31 = vld [vmem:[%s1153_s5 + $0x18] sm:$0xff]   ;;  %v887_v32 = vld [vmem:[%s1153_s5 + $0x20] sm:$0xff]  }
  0xa6   : > { %v373_v43 = vpop.permute.xlu1 %372  ;;  %v772_v36 = vld [vmem:[%s1152_s4] ss:$0 sm:$0xff] }
  0xa7   : > { %v347_v42 = vadd.f32 %v345_v38, %v331_v29  ;;  %v371_v44 = vpop.permute.xlu0 %370  ;;  %v368_v45 = vadd.f32 %v366_v30, %v360_v37  ;;  %v375_v46 = vsel %vm324_vm2, %v373_v43, 0.0  ;;  %v883_v29 = vld [vmem:[%s1153_s5] sm:$0xff]   ;;  %v885_v30 = vld [vmem:[%s1153_s5 + $0x10] sm:$0xff]  }
  0xa8   : > { %v374_v47 = vsel %vm324_vm2, %v371_v44, 0.0  ;;  %v379_v53 = vmul.f32 %v377_v39, %v375_v46  ;;  %833 = vmatpush3.bf16.msra.mxu1 %v883_v29 }
  0xa9   : > { %v361_v49 = vadd.f32 %v359_v41, %v347_v42  ;;  %v378_v50 = vmul.f32 %v377_v39, %v374_v47  ;;  %834 = vmatprep.subr.bf16.mxu1 %v927_v1 }
  0xaa   : > { %v385_v54 = vpop.permute.xlu1 %384 }
  0xab   : > { %v369_v52 = vadd.f32 %v367_v40, %v361_v49  ;;  %v383_v55 = vpop.permute.xlu0 %382  ;;  %v387_v58 = vsel %vm325_vm1, %v385_v54, 0.0  ;;  %v380_v61 = vadd.f32 %v378_v50, %v368_v45 }
  0xac   : > { %v386_v59 = vsel %vm325_vm1, %v383_v55, 0.0  ;;  %v391_v62 = vmul.f32 %v389_v51, %v387_v58  ;;  %835 = vmatpush3.bf16.msra.mxu1 %v884_v18 }
  0xad   : > { %v381_v60 = vadd.f32 %v379_v53, %v369_v52  ;;  %v390_v63 = vmul.f32 %v389_v51, %v386_v59  ;;  %836 = vmatprep.subr.bf16.mxu1 %v927_v1  ;;  %v783_v51 = vld [vmem:[%s1154_s6] ss:$0 sm:$0xff] }
  0xae   : > { %v405_v4 = vpop.permute.xlu1 %404 }
  0xaf   : > { %v393_v2 = vadd.f32 %v391_v62, %v381_v60  ;;  %v392_v3 = vadd.f32 %v390_v63, %v380_v61  ;;  %v403_v5 = vpop.permute.xlu0 %402  ;;  %v407_v6 = vsel %vm324_vm2, %v405_v4, 0.0 }
  0xb0   : > { %v406_v7 = vsel %vm324_vm2, %v403_v5, 0.0  ;;  %v411_v9 = vmul.f32 %v409_v0, %v407_v6  ;;  %837 = vmatpush3.bf16.msra.mxu1 %v885_v30 }
  0xb1   : > { %v401_v8 = vadd.f32 %v399_v56, %v393_v2  ;;  %v400_v10 = vadd.f32 %v398_v57, %v392_v3  ;;  %v410_v11 = vmul.f32 %v409_v0, %v406_v7  ;;  %838 = vmatprep.subr.bf16.mxu1 %v927_v1 }
  0xb2   : > { %v417_v13 = vpop.permute.xlu1 %416 }
  0xb3   : > { %v415_v14 = vpop.permute.xlu0 %414  ;;  %v419_v15 = vsel %vm325_vm1, %v417_v13, 0.0  ;;  %v413_v17 = vadd.f32 %v411_v9, %v401_v8  ;;  %v412_v19 = vadd.f32 %v410_v11, %v400_v10 }
  0xb4   : > { %v418_v16 = vsel %vm325_vm1, %v415_v14, 0.0  ;;  %v423_v20 = vmul.f32 %v421_v12, %v419_v15  ;;  %839 = vmatpush3.bf16.msra.mxu1 %v886_v31 }
  0xb5   : > { %v422_v21 = vmul.f32 %v421_v12, %v418_v16  ;;  %840 = vmatprep.subr.bf16.mxu1 %v927_v1 }
  0xb6   : > { %v425_v22 = vadd.f32 %v423_v20, %v413_v17 }
  0xb7   : > { %v424_v23 = vadd.f32 %v422_v21, %v412_v19 }
  0xb8   : > { %v429_v24 = vmul.f32 0.01, %v425_v22  ;;  %vm427_vm4 = vcmp.ge.f32.partialorder %v425_v22, 0.0  ;;  %841 = vmatpush3.bf16.msra.mxu1 %v887_v32 }
  0xb9   : > { %v428_v25 = vmul.f32 0.01, %v424_v23  ;;  %vm426_vm3 = vcmp.ge.f32.partialorder %v424_v23, 0.0  ;;  %842 = vmatprep.subr.bf16.mxu1 %v927_v1 }
  0xba   : > { %v431_v27 = vsel %vm427_vm4, %v425_v22, %v429_v24 }
  0xbb   : > { %v430_v26 = vsel %vm426_vm3, %v424_v23, %v428_v25 }
  0xbc   : > { %v432_v28 = vpack.c.bf16 %v431_v27, %v430_v26  ;;  %843 = vmatpush3.bf16.msra.mxu1 %v888_v33 }
  0xbd   : > { %844 = vmatprep.subr.bf16.mxu1 %v927_v1 }
  0xbe   : > { %829 = vmatmul.mubr.bf16.vlgmr.msra.gmra.mrb[0].mxu0 %v432_v28 }
  0xc0   : > { %845 = vmatpush3.bf16.msra.mxu1 %v889_v34 }
  0xc1   : > { %846 = vmatprep.subr.bf16.mxu1 %v927_v1 }
  0xc4   : > { %847 = vmatpush3.bf16.msra.mxu1 %v890_v35 }
 0x191   : > { %v538_v37 = vpop.f32.mrb[0].mxu0 }
 0x192   : > { %v539_v38 = vadd.f32 %v772_v36, %v538_v37  ;;  %v830_v39 = vpop.f32.mrb[1].mxu0 }
 0x193   : > { %v541_v40 = vpop.f32.mrb[2].mxu0 }
 0x194   : > { %v781_v41 = vmul.f32 -1.442695, %v539_v38  ;;  %v542_v42 = vadd.f32 %v772_v36, %v541_v40  ;;  %v831_v43 = vpop.f32.mrb[3].mxu0 }
 0x196   : > { %891 = vpow2.f32 %v781_v41  ;;  %v782_v44 = vmul.f32 -1.442695, %v542_v42 }
 0x198   : > { %893 = vpow2.f32 %v782_v44 }
 0x1a0   : > { %v892_v45 = vpop.eup %891 }
 0x1a1   : > { %v551_v46 = vadd.f32 1.0, %v892_v45 }
 0x1a2   : > { %v894_v47 = vpop.eup %893 }
 0x1a3   : > { %v552_v1 = vadd.f32 1.0, %v894_v47  ;;  %895 = vrcp.f32 %v551_v46 }
 0x1a5   : > { %897 = vrcp.f32 %v552_v1 }
 0x1ad   : > { %v896_v48 = vpop.eup %895 }
 0x1af   : > { %v898_v49 = vpop.eup %897 }
 0x1b0   : > { %v557_v50 = vpack.c.bf16 %v898_v49, %v896_v48 }
 0x1b2   : > { %849 = vmatmul.mubr.bf16.vlgmr.msra.gmra.mrb[0].mxu1 %v557_v50 }
 0x285   : > { %v663_v52 = vpop.f32.mrb[0].mxu1 }
 0x286   : > { %v664_v53 = vadd.f32 %v783_v51, %v663_v52  ;;  %v850_v54 = vpop.f32.mrb[1].mxu1 }
 0x287   : > { %v666_v55 = vpop.f32.mrb[2].mxu1 }
 0x288   : > { %670 = vst [vmem:[%s311_s28] sm:$0xff] %v664_v53  ;;  %v667_v56 = vadd.f32 %v783_v51, %v666_v55  ;;  %v851_v57 = vpop.f32.mrb[3].mxu1 }
 0x28a   : > { %671 = vst [vmem:[%s311_s28 + $0x8] sm:$0xff] %v667_v56 }
 0x28b PF: > { %s18_s24 = sadd.s32 1, %s924_s24  }
 0x28c   : > { %p15_p2 = scmp.ge.s32.totalorder %s18_s24, 5  }
 0x28e   :  { %17 = sbr.rel (!%p15_p2) target bundleno = 1 (0x1), region = 86 }
 0x295   :  { %694 = vsyncpa [#allocation4], 1 }
 0x296   :  { %696 = vsyncpa [#allocation4 + $0x1], 1 }

</bundles_post_ra>
